<compile_context>
chip_gen: v5e
topology: v5e:2x2
jax: 0.10.0
libtpu: 0.0.40
codegen_flags: <defaults>
</compile_context>

<pallas_src>
import jax
import jax.numpy as jnp
from jax.experimental import pallas as pl
from jax.experimental.pallas import tpu as pltpu


def _round_up(n, m):
    return ((n + m - 1) // m) * m


# ----------------------------------------------------------------------------
# Kernel: one batch tile through the whole autoencoder.
# ----------------------------------------------------------------------------
def ae_kernel(x_ref, w1_ref, b1_ref, w2_ref, b2_ref, w3_ref, b3_ref,
              w4_ref, b4_ref, o_ref):
    # x arrives in f32; cast to bf16 in-register right before the MXU.
    xb = x_ref[...].astype(jnp.bfloat16)
    # encoder: Linear -> ReLU -> Linear -> ReLU   (bf16 MXU, f32 accumulate)
    h = jnp.dot(xb, w1_ref[...], preferred_element_type=jnp.float32)
    h = jnp.maximum(h + b1_ref[...], 0.0).astype(jnp.bfloat16)
    z = jnp.dot(h, w2_ref[...], preferred_element_type=jnp.float32)
    z = jnp.maximum(z + b2_ref[...], 0.0).astype(jnp.bfloat16)
    # decoder: Linear -> ReLU -> Linear
    d = jnp.dot(z, w3_ref[...], preferred_element_type=jnp.float32)
    d = jnp.maximum(d + b3_ref[...], 0.0).astype(jnp.bfloat16)
    out = jnp.dot(d, w4_ref[...], preferred_element_type=jnp.float32)
    o_ref[...] = (out + b4_ref[...]).astype(o_ref.dtype)


# ----------------------------------------------------------------------------
# One-time parameter preparation (hoisted out of the per-call path).
# Weights are stored (in, out) so the kernel computes x @ W + b.
# ----------------------------------------------------------------------------
def prepare_params(params):
    w1, b1 = params["w1"], params["b1"]
    w2, b2 = params["w2"], params["b2"]
    w3, b3 = params["w3"], params["b3"]
    w4, b4 = params["w4"], params["b4"]
    F, H = w1.shape
    L = w2.shape[1]
    Fp, Hp, Lp = _round_up(F, 128), _round_up(H, 128), _round_up(L, 128)
    bf16 = jnp.bfloat16

    def pad2(a, rows, cols, dt):
        if a.shape == (rows, cols) and a.dtype == dt:
            return a.astype(dt)
        return jnp.zeros((rows, cols), dt).at[:a.shape[0], :a.shape[1]].set(
            a.astype(dt))

    return dict(
        F=F, H=H, L=L, Fp=Fp, Hp=Hp, Lp=Lp,
        w1=pad2(w1, Fp, Hp, bf16), b1=pad2(b1, 1, Hp, jnp.float32),
        w2=pad2(w2, Hp, Lp, bf16), b2=pad2(b2, 1, Lp, jnp.float32),
        w3=pad2(w3, Lp, Hp, bf16), b3=pad2(b3, 1, Hp, jnp.float32),
        w4=pad2(w4, Hp, Fp, bf16), b4=pad2(b4, 1, Fp, jnp.float32),
    )


def _pick_tile_b(B, Fp, out_itemsize):
    """Batch-tile heuristic: amortize per-step overhead, even #steps for v7x."""
    if B <= 128:
        return _round_up(max(B, 8), 8)            # single grid step
    # Keep double-buffered x(f32) + out tiles within ~8 MiB of VMEM.
    per_row = 2 * Fp * (4 + out_itemsize)
    row_cap = max(256, min(2048, (8 * 1024 * 1024) // per_row))
    n_steps = max(2, pl.cdiv(B, row_cap))          # >= 2 steps (v7x has 2 TCs)
    if n_steps % 2:
        n_steps += 1                               # even number of steps
    return _round_up(pl.cdiv(B, n_steps), 8)


# ----------------------------------------------------------------------------
# Forward pass.
# ----------------------------------------------------------------------------
def ae_forward(x, prep, *, tile_b=None, out_dtype=jnp.float32):
    """x: [B, input_size] float32.  prep: output of prepare_params()."""
    B, F = x.shape
    assert F == prep["F"], "input feature dim mismatch"
    Fp, Hp, Lp = prep["Fp"], prep["Hp"], prep["Lp"]

    out_itemsize = jnp.dtype(out_dtype).itemsize
    if tile_b is None:
        tile_b = _pick_tile_b(B, Fp, out_itemsize)
    Bp = _round_up(B, tile_b)
    grid = (Bp // tile_b,)

    # x: pad in native f32 only (no bf16 copy pass); skip entirely if aligned.
    if (Bp, Fp) == (B, F):
        xp = x
    else:
        xp = jnp.zeros((Bp, Fp), jnp.float32).at[:B, :F].set(x)

    def rep(shape):
        # full-array block, replicated to every grid step (weights / biases)
        return pl.BlockSpec(shape, lambda i: (0, 0))

    # advisory cost estimate for the XLA scheduler
    mm_terms = Fp * Hp + Hp * Lp + Lp * Hp + Hp * Fp
    flops = 2 * Bp * mm_terms
    bytes_accessed = (4 * Bp * Fp                  # f32 x in
                      + 2 * mm_terms               # bf16 weights
                      + 4 * (Hp + Lp + Hp + Fp)    # f32 biases
                      + out_itemsize * Bp * Fp)    # out
    cost = pl.CostEstimate(flops=flops, transcendentals=0,
                           bytes_accessed=bytes_accessed)

    out = pl.pallas_call(
        ae_kernel,
        out_shape=jax.ShapeDtypeStruct((Bp, Fp), out_dtype),
        grid=grid,
        in_specs=[
            pl.BlockSpec((tile_b, Fp), lambda i: (i, 0)),   # x tile
            rep((Fp, Hp)), rep((1, Hp)),                    # W1, b1
            rep((Hp, Lp)), rep((1, Lp)),                    # W2, b2
            rep((Lp, Hp)), rep((1, Hp)),                    # W3, b3
            rep((Hp, Fp)), rep((1, Fp)),                    # W4, b4
        ],
        out_specs=pl.BlockSpec((tile_b, Fp), lambda i: (i, 0)),
        compiler_params=pltpu.CompilerParams(
            dimension_semantics=("parallel",)),
        cost_estimate=cost,
    )(xp, prep["w1"], prep["b1"], prep["w2"], prep["b2"],
      prep["w3"], prep["b3"], prep["w4"], prep["b4"])

    # strip batch / feature padding
    if (Bp, Fp) == (B, F):
        return out
    return out[:B, :F]


# ----------------------------------------------------------------------------
# Init + reference + test driver.
# ----------------------------------------------------------------------------
def init_params(key, input_size, hidden_size=128, latent_size=32):
    """Deterministic synthetic init (PyTorch-Linear-like uniform ranges).
    Weights stored (in, out) so the kernel computes x @ W + b."""
    ks = jax.random.split(key, 8)

    def lin(kw, kb, fan_in, fan_out):
        bound = 1.0 / jnp.sqrt(fan_in)
        w = jax.random.uniform(kw, (fan_in, fan_out), jnp.float32, -bound, bound)
        b = jax.random.uniform(kb, (1, fan_out), jnp.float32, -bound, bound)
        return w, b

    w1, b1 = lin(ks[0], ks[1], input_size, hidden_size)
    w2, b2 = lin(ks[2], ks[3], hidden_size, latent_size)
    w3, b3 = lin(ks[4], ks[5], latent_size, hidden_size)
    w4, b4 = lin(ks[6], ks[7], hidden_size, input_size)
    return dict(w1=w1, b1=b1, w2=w2, b2=b2, w3=w3, b3=b3, w4=w4, b4=b4)


def ae_reference(x, p):
    """Pure-JAX reference mirroring the kernel's bf16-in / f32-accumulate math."""
    def bf(a):
        return a.astype(jnp.bfloat16).astype(jnp.float32)
    h = jnp.maximum(bf(x) @ bf(p["w1"]) + p["b1"], 0.0)
    z = jnp.maximum(bf(h) @ bf(p["w2"]) + p["b2"], 0.0)
    d = jnp.maximum(bf(z) @ bf(p["w3"]) + p["b3"], 0.0)
    return bf(d) @ bf(p["w4"]) + p["b4"]


if __name__ == "__main__":
    key = jax.random.PRNGKey(0)
    k_x, k_p = jax.random.split(key)

    batch, input_size, hidden_size, latent_size = 16, 64, 128, 32
    x = jax.random.normal(k_x, (batch, input_size), dtype=jnp.float32)
    params = init_params(k_p, input_size, hidden_size, latent_size)

    # One-time (cacheable) padded/bf16 parameter prep — hoisted out of the
    # per-call path.
    prep = prepare_params(params)

    out = ae_forward(x, prep)
    out = jax.block_until_ready(out)

    ref = ae_reference(x, params)
    assert out.shape == (batch, input_size)
    assert jnp.allclose(out, ref, atol=2e-3, rtol=2e-3), float(
        jnp.max(jnp.abs(out - ref)))

    print("KERNEL_OK")
</pallas_src>

<mosaic_0001>
module attributes {stable_mosaic.version = 11 : i64} {
  func.func @ae_kernel(%arg0: i32, %arg1: memref<16x128xf32, #tpu.memory_space<vmem>>, %arg2: memref<128x128xbf16, #tpu.memory_space<vmem>>, %arg3: memref<1x128xf32, #tpu.memory_space<vmem>>, %arg4: memref<128x128xbf16, #tpu.memory_space<vmem>>, %arg5: memref<1x128xf32, #tpu.memory_space<vmem>>, %arg6: memref<128x128xbf16, #tpu.memory_space<vmem>>, %arg7: memref<1x128xf32, #tpu.memory_space<vmem>>, %arg8: memref<128x128xbf16, #tpu.memory_space<vmem>>, %arg9: memref<1x128xf32, #tpu.memory_space<vmem>>, %arg10: memref<16x128xf32, #tpu.memory_space<vmem>>) attributes {dimension_semantics = [#tpu.dimension_semantics<parallel>], iteration_bounds = array<i64: 1>, scalar_prefetch = 0 : i64, scratch_operands = 0 : i64, tpu.core_type = #tpu.core_type<tc>, window_params = [{transform_indices = @transform_0, window_bounds = array<i64: 16, 128>}, {pipeline_mode = #tpu.pipeline_mode<synchronous>, transform_indices = @transform_1, window_bounds = array<i64: 128, 128>}, {pipeline_mode = #tpu.pipeline_mode<synchronous>, transform_indices = @transform_2, window_bounds = array<i64: 1, 128>}, {pipeline_mode = #tpu.pipeline_mode<synchronous>, transform_indices = @transform_3, window_bounds = array<i64: 128, 128>}, {pipeline_mode = #tpu.pipeline_mode<synchronous>, transform_indices = @transform_4, window_bounds = array<i64: 1, 128>}, {pipeline_mode = #tpu.pipeline_mode<synchronous>, transform_indices = @transform_5, window_bounds = array<i64: 128, 128>}, {pipeline_mode = #tpu.pipeline_mode<synchronous>, transform_indices = @transform_6, window_bounds = array<i64: 1, 128>}, {pipeline_mode = #tpu.pipeline_mode<synchronous>, transform_indices = @transform_7, window_bounds = array<i64: 128, 128>}, {pipeline_mode = #tpu.pipeline_mode<synchronous>, transform_indices = @transform_8, window_bounds = array<i64: 1, 128>}, {transform_indices = @transform_9, window_bounds = array<i64: 16, 128>}]} {
    %c0 = arith.constant 0 : index
    %c0_0 = arith.constant 0 : index
    %0 = vector.load %arg1[%c0, %c0_0] : memref<16x128xf32, #tpu.memory_space<vmem>>, vector<16x128xf32>
    %1 = arith.truncf %0 : vector<16x128xf32> to vector<16x128xbf16>
    %c0_1 = arith.constant 0 : index
    %c0_2 = arith.constant 0 : index
    %2 = vector.load %arg2[%c0_1, %c0_2] : memref<128x128xbf16, #tpu.memory_space<vmem>>, vector<128x128xbf16>
    %cst = arith.constant dense<0.000000e+00> : vector<16x128xf32>
    %3 = tpu.matmul %1, %2, %cst {dimension_numbers = #tpu.dot_dimension_numbers<[1], [0], [0], [1], [0, 0, 1, 1], [], []>} : vector<16x128xbf16>, vector<128x128xbf16>, vector<16x128xf32> -> vector<16x128xf32>
    %c0_3 = arith.constant 0 : index
    %c0_4 = arith.constant 0 : index
    %4 = vector.load %arg3[%c0_3, %c0_4] : memref<1x128xf32, #tpu.memory_space<vmem>>, vector<1x128xf32>
    %5 = vector.broadcast %4 : vector<1x128xf32> to vector<16x128xf32>
    %6 = arith.addf %3, %5 : vector<16x128xf32>
    %cst_5 = arith.constant 0.000000e+00 : f32
    %7 = vector.broadcast %cst_5 : f32 to vector<16x128xf32>
    %8 = arith.maximumf %6, %7 : vector<16x128xf32>
    %9 = arith.truncf %8 : vector<16x128xf32> to vector<16x128xbf16>
    %c0_6 = arith.constant 0 : index
    %c0_7 = arith.constant 0 : index
    %10 = vector.load %arg4[%c0_6, %c0_7] : memref<128x128xbf16, #tpu.memory_space<vmem>>, vector<128x128xbf16>
    %cst_8 = arith.constant dense<0.000000e+00> : vector<16x128xf32>
    %11 = tpu.matmul %9, %10, %cst_8 {dimension_numbers = #tpu.dot_dimension_numbers<[1], [0], [0], [1], [0, 0, 1, 1], [], []>} : vector<16x128xbf16>, vector<128x128xbf16>, vector<16x128xf32> -> vector<16x128xf32>
    %c0_9 = arith.constant 0 : index
    %c0_10 = arith.constant 0 : index
    %12 = vector.load %arg5[%c0_9, %c0_10] : memref<1x128xf32, #tpu.memory_space<vmem>>, vector<1x128xf32>
    %13 = vector.broadcast %12 : vector<1x128xf32> to vector<16x128xf32>
    %14 = arith.addf %11, %13 : vector<16x128xf32>
    %cst_11 = arith.constant 0.000000e+00 : f32
    %15 = vector.broadcast %cst_11 : f32 to vector<16x128xf32>
    %16 = arith.maximumf %14, %15 : vector<16x128xf32>
    %17 = arith.truncf %16 : vector<16x128xf32> to vector<16x128xbf16>
    %c0_12 = arith.constant 0 : index
    %c0_13 = arith.constant 0 : index
    %18 = vector.load %arg6[%c0_12, %c0_13] : memref<128x128xbf16, #tpu.memory_space<vmem>>, vector<128x128xbf16>
    %cst_14 = arith.constant dense<0.000000e+00> : vector<16x128xf32>
    %19 = tpu.matmul %17, %18, %cst_14 {dimension_numbers = #tpu.dot_dimension_numbers<[1], [0], [0], [1], [0, 0, 1, 1], [], []>} : vector<16x128xbf16>, vector<128x128xbf16>, vector<16x128xf32> -> vector<16x128xf32>
    %c0_15 = arith.constant 0 : index
    %c0_16 = arith.constant 0 : index
    %20 = vector.load %arg7[%c0_15, %c0_16] : memref<1x128xf32, #tpu.memory_space<vmem>>, vector<1x128xf32>
    %21 = vector.broadcast %20 : vector<1x128xf32> to vector<16x128xf32>
    %22 = arith.addf %19, %21 : vector<16x128xf32>
    %cst_17 = arith.constant 0.000000e+00 : f32
    %23 = vector.broadcast %cst_17 : f32 to vector<16x128xf32>
    %24 = arith.maximumf %22, %23 : vector<16x128xf32>
    %25 = arith.truncf %24 : vector<16x128xf32> to vector<16x128xbf16>
    %c0_18 = arith.constant 0 : index
    %c0_19 = arith.constant 0 : index
    %26 = vector.load %arg8[%c0_18, %c0_19] : memref<128x128xbf16, #tpu.memory_space<vmem>>, vector<128x128xbf16>
    %cst_20 = arith.constant dense<0.000000e+00> : vector<16x128xf32>
    %27 = tpu.matmul %25, %26, %cst_20 {dimension_numbers = #tpu.dot_dimension_numbers<[1], [0], [0], [1], [0, 0, 1, 1], [], []>} : vector<16x128xbf16>, vector<128x128xbf16>, vector<16x128xf32> -> vector<16x128xf32>
    %c0_21 = arith.constant 0 : index
    %c0_22 = arith.constant 0 : index
    %28 = vector.load %arg9[%c0_21, %c0_22] : memref<1x128xf32, #tpu.memory_space<vmem>>, vector<1x128xf32>
    %29 = vector.broadcast %28 : vector<1x128xf32> to vector<16x128xf32>
    %30 = arith.addf %27, %29 : vector<16x128xf32>
    %c0_23 = arith.constant 0 : index
    %c0_24 = arith.constant 0 : index
    %31 = vector.load %arg10[%c0_23, %c0_24] : memref<16x128xf32, #tpu.memory_space<vmem>>, vector<16x128xf32>
    tpu.vector_store %arg10[%c0_23, %c0_24], %30 {strides = array<i32>} : memref<16x128xf32, #tpu.memory_space<vmem>>, vector<16x128xf32>,
    return
  }
  func.func @transform_0(%arg0: i32) -> (i32, i32) {
    %c0_i32 = arith.constant 0 : i32
    %c0_i32_0 = arith.constant 0 : i32
    return %arg0, %c0_i32 : i32, i32
  }
  func.func @transform_1(%arg0: i32) -> (i32, i32) {
    %c0_i32 = arith.constant 0 : i32
    %c0_i32_0 = arith.constant 0 : i32
    %c0_i32_1 = arith.constant 0 : i32
    return %c0_i32, %c0_i32_0 : i32, i32
  }
  func.func @transform_2(%arg0: i32) -> (i32, i32) {
    %c0_i32 = arith.constant 0 : i32
    %c0_i32_0 = arith.constant 0 : i32
    %c0_i32_1 = arith.constant 0 : i32
    return %c0_i32, %c0_i32_0 : i32, i32
  }
  func.func @transform_3(%arg0: i32) -> (i32, i32) {
    %c0_i32 = arith.constant 0 : i32
    %c0_i32_0 = arith.constant 0 : i32
    %c0_i32_1 = arith.constant 0 : i32
    return %c0_i32, %c0_i32_0 : i32, i32
  }
  func.func @transform_4(%arg0: i32) -> (i32, i32) {
    %c0_i32 = arith.constant 0 : i32
    %c0_i32_0 = arith.constant 0 : i32
    %c0_i32_1 = arith.constant 0 : i32
    return %c0_i32, %c0_i32_0 : i32, i32
  }
  func.func @transform_5(%arg0: i32) -> (i32, i32) {
    %c0_i32 = arith.constant 0 : i32
    %c0_i32_0 = arith.constant 0 : i32
    %c0_i32_1 = arith.constant 0 : i32
    return %c0_i32, %c0_i32_0 : i32, i32
  }
  func.func @transform_6(%arg0: i32) -> (i32, i32) {
    %c0_i32 = arith.constant 0 : i32
    %c0_i32_0 = arith.constant 0 : i32
    %c0_i32_1 = arith.constant 0 : i32
    return %c0_i32, %c0_i32_0 : i32, i32
  }
  func.func @transform_7(%arg0: i32) -> (i32, i32) {
    %c0_i32 = arith.constant 0 : i32
    %c0_i32_0 = arith.constant 0 : i32
    %c0_i32_1 = arith.constant 0 : i32
    return %c0_i32, %c0_i32_0 : i32, i32
  }
  func.func @transform_8(%arg0: i32) -> (i32, i32) {
    %c0_i32 = arith.constant 0 : i32
    %c0_i32_0 = arith.constant 0 : i32
    %c0_i32_1 = arith.constant 0 : i32
    return %c0_i32, %c0_i32_0 : i32, i32
  }
  func.func @transform_9(%arg0: i32) -> (i32, i32) {
    %c0_i32 = arith.constant 0 : i32
    %c0_i32_0 = arith.constant 0 : i32
    return %arg0, %c0_i32 : i32, i32
  }
}

</mosaic_0001>

<bundles_post_ra>
// kernel: tpu_custom_call.1
= control target key start
LH: loop header
LB: loop body
LE: loop exit
PB: predicated region body
PF: predicated region fallthrough
CT: control target
= control target key end

     0   :  { %14 = vsyncpa [#allocation3], 0  ;;  %s908_s0 = inlined_call_operand.hbm [shape: f32[16,128], index: 0, kind: input, shape index: {}]   ;;  %s909_s1 = inlined_call_operand.hbm [shape: bf16[128,128], index: 1, kind: input, shape index: {}]   ;;  %s910_s2 = inlined_call_operand.vmem [shape: f32[1,128], index: 2, kind: input, shape index: {}]   ;;  %s911_s3 = inlined_call_operand.hbm [shape: bf16[128,128], index: 3, kind: input, shape index: {}]   ;;  %s912_s4 = inlined_call_operand.vmem [shape: f32[1,128], index: 4, kind: input, shape index: {}]   ;;  %s913_s5 = inlined_call_operand.hbm [shape: bf16[128,128], index: 5, kind: input, shape index: {}]   ;;  %s914_s6 = inlined_call_operand.vmem [shape: f32[1,128], index: 6, kind: input, shape index: {}]   ;;  %s915_s7 = inlined_call_operand.hbm [shape: bf16[128,128], index: 7, kind: input, shape index: {}]   ;;  %s916_s8 = inlined_call_operand.vmem [shape: f32[1,128], index: 8, kind: input, shape index: {}]   ;;  %s917_s9 = inlined_call_operand.hbm [shape: f32[16,128], index: 9, kind: output, shape index: {}]  }
   0x1   :  { %15 = vsyncpa [#allocation6], 0 }
   0x2   :  { %16 = vsyncpa [#allocation9], 0  ;;  %s35_s11 = sshll.u32 %s909_s1, 4  ;;  %s36_s11 = int_to_ptr.hbm [resolvable:$true] %s35_s11 }
   0x3   :  { %17 = vsyncpa [#allocation4], 0  ;;  %s800_s12 = smov [#allocation5]   ;;  %s65_s16 = sshll.u32 %s913_s5, 4  ;;  %s66_s16 = int_to_ptr.hbm [resolvable:$true] %s65_s16 }
   0x4   :  { %s37_s13 = sshll.u32 %s800_s12, 4  ;;  %s801_s17 = smov 64   ;;  %s38_s13 = int_to_ptr.vmem [resolvable:$true] %s37_s13 }
   0x5   :  { %s802_s18 = smov 4   ;;  %s803_s19 = smov [#allocation8]  }
   0x6   :  { %43 = dma.hbm_to_vmem [thread:$0]  %s36_s11, 1024, %s38_s13, [#allocation6], %s801_s17, %s801_s17, %s802_s18  }
   0x7   :  { %s67_s20 = sshll.u32 %s803_s19, 4  ;;  %s22_s22 = sshll.u32 %s908_s0, 4  ;;  %s68_s20 = int_to_ptr.vmem [resolvable:$true] %s67_s20  ;;  %s23_s22 = int_to_ptr.hbm [resolvable:$true] %s22_s22 }
   0x8   :  { %73 = dma.hbm_to_vmem [thread:$0]  %s66_s16, 1024, %s68_s20, [#allocation9], %s801_s17, %s801_s17, %s802_s18  }
   0x9   :  { %s804_s5 = smov [#allocation2]   ;;  %s50_s26 = sshll.u32 %s911_s3, 4  ;;  %s51_s26 = int_to_ptr.hbm [resolvable:$true] %s50_s26 }
   0xa   :  { %s24_s23 = sshll.u32 %s804_s5, 4  ;;  %s805_s27 = smov 128   ;;  %s25_s23 = int_to_ptr.vmem [resolvable:$true] %s24_s23 }
   0xb   :  { %s806_s28 = smov 8   ;;  %s807_s0 = smov [#allocation7]  }
   0xc   :  { %30 = dma.hbm_to_vmem [thread:$0]  %s23_s22, 256, %s25_s23, [#allocation3], %s805_s27, %s805_s27, %s806_s28  }
   0xd   :  { %s52_s29 = sshll.u32 %s807_s0, 4  ;;  %s80_s11 = sshll.u32 %s915_s7, 4  ;;  %s53_s29 = int_to_ptr.vmem [resolvable:$true] %s52_s29  ;;  %s81_s11 = int_to_ptr.hbm [resolvable:$true] %s80_s11 }
   0xe   :  { %58 = dma.hbm_to_vmem [thread:$0]  %s51_s26, 1024, %s53_s29, [#allocation6], %s801_s17, %s801_s17, %s802_s18  }
   0xf   :  { %s808_s3 = smov [#allocation10]  }
  0x10   :  { %s82_s12 = sshll.u32 %s808_s3, 4  ;;  %s83_s12 = int_to_ptr.vmem [resolvable:$true] %s82_s12 }
  0x11   :  { %88 = dma.hbm_to_vmem [thread:$0]  %s81_s11, 1024, %s83_s12, [#allocation9], %s801_s17, %s801_s17, %s802_s18  }
  0x12   :  { %792 = dma.done.wait [#allocation3], 256  }
  0x13   :  { %793 = vsyncadd [#allocation3], 4294967040 }
  0x14   :  { %794 = dma.done.wait [#allocation6], 2048  }
  0x15   :  { %795 = vsyncadd [#allocation6], 4294965248 }
  0x16   :  { %796 = dma.done.wait [#allocation9], 2048  }
  0x17   :  { %797 = vsyncadd [#allocation9], 4294965248  ;;  %v609_v0 = vld [vmem:[#allocation5 + $0x38] sm:$0xff]  ;;  %v608_v1 = vld [vmem:[#allocation5 + $0x30] sm:$0xff]  ;;  %s809_s18 = smov [#allocation11]  }
  0x18   :  { %182 = vmatpush.bf16.msra.mxu0 %v609_v0  ;;  %v617_v2 = vld [vmem:[#allocation7 + $0x38] sm:$0xff]  ;;  %v616_v3 = vld [vmem:[#allocation7 + $0x30] sm:$0xff]  ;;  %v607_v4 = vld [vmem:[#allocation5 + $0x28] sm:$0xff]  ;;  %s457_s19 = sshll.u32 %s809_s18, 4  ;;  %s458_s19 = int_to_ptr.vmem [resolvable:$true] %s457_s19 }
  0x19   :  { %267 = vmatpush.bf16.msra.mxu1 %v617_v2  ;;  %v615_v5 = vld [vmem:[#allocation7 + $0x28] sm:$0xff]  ;;  %v606_v6 = vld [vmem:[#allocation5 + $0x20] sm:$0xff]  ;;  %v605_v8 = vld [vmem:[#allocation5 + $0x18] sm:$0xff] }
  0x1a   :  { %v614_v7 = vld [vmem:[#allocation7 + $0x20] sm:$0xff]  ;;  %v604_v9 = vld [vmem:[#allocation5 + $0x10] sm:$0xff]  ;;  %v603_v10 = vld [vmem:[#allocation5 + $0x8] sm:$0xff] }
  0x1b   :  { %v602_v11 = vld [vmem:[#allocation5] sm:$0xff]  ;;  %v111_v12 = vld [vmem:[#allocation2] sm:$0xff]  ;;  %v112_v13 = vld [vmem:[#allocation2 + $0x8] sm:$0xff] }
  0x1c   :  { %183 = vmatpush.bf16.msra.mxu0 %v608_v1  ;;  %v113_v14 = vpack.c.bf16 %v112_v13, %v111_v12  ;;  %v613_v15 = vld [vmem:[#allocation7 + $0x18] sm:$0xff]  ;;  %v612_v16 = vld [vmem:[#allocation7 + $0x10] sm:$0xff]  ;;  %v611_v17 = vld [vmem:[#allocation7 + $0x8] sm:$0xff] }
  0x1d   :  { %268 = vmatpush.bf16.msra.mxu1 %v616_v3  ;;  %v610_v18 = vld [vmem:[#allocation7] sm:$0xff]  ;;  %v625_v19 = vld [vmem:[#allocation8 + $0x38] sm:$0xff]  ;;  %v624_v20 = vld [vmem:[#allocation8 + $0x30] sm:$0xff] }
  0x1e   :  { %352 = vmatpush.bf16.msra.mxu2 %v625_v19  ;;  %v623_v21 = vld [vmem:[#allocation8 + $0x28] sm:$0xff]  ;;  %v622_v22 = vld [vmem:[#allocation8 + $0x20] sm:$0xff]  ;;  %v644_v24 = vld [vmem:[%s910_s2] ss:$0 sm:$0xff] }
  0x1f   :  { %v621_v31 = vld [vmem:[#allocation8 + $0x18] sm:$0xff]  ;;  %v620_v32 = vld [vmem:[#allocation8 + $0x10] sm:$0xff]  ;;  %v619_v33 = vld [vmem:[#allocation8 + $0x8] sm:$0xff] }
  0x20   :  { %184 = vmatpush.bf16.msra.mxu0 %v607_v4  ;;  %v618_v34 = vld [vmem:[#allocation8] sm:$0xff]  ;;  %v633_v35 = vld [vmem:[#allocation10 + $0x38] sm:$0xff]  ;;  %v632_v36 = vld [vmem:[#allocation10 + $0x30] sm:$0xff] }
  0x21   :  { %269 = vmatpush.bf16.msra.mxu1 %v615_v5  ;;  %437 = vmatpush.bf16.msra.mxu3 %v633_v35  ;;  %v631_v37 = vld [vmem:[#allocation10 + $0x28] sm:$0xff]  ;;  %v630_v38 = vld [vmem:[#allocation10 + $0x20] sm:$0xff]  ;;  %v645_v40 = vld [vmem:[%s912_s4] ss:$0 sm:$0xff] }
  0x22   :  { %353 = vmatpush.bf16.msra.mxu2 %v624_v20  ;;  %v629_v47 = vld [vmem:[#allocation10 + $0x18] sm:$0xff]  ;;  %v628_v48 = vld [vmem:[#allocation10 + $0x10] sm:$0xff]  ;;  %v627_v49 = vld [vmem:[#allocation10 + $0x8] sm:$0xff] }
  0x23   :  { %v626_v50 = vld [vmem:[#allocation10] sm:$0xff]  ;;  %v646_v52 = vld [vmem:[%s914_s6] ss:$0 sm:$0xff]  ;;  %s459_s6 = sshll.u32 %s917_s9, 4  ;;  %s460_s6 = int_to_ptr.hbm [resolvable:$true] %s459_s6 }
  0x24   :  { %185 = vmatpush.bf16.msra.mxu0 %v606_v6  ;;  %v647_v59 = vld [vmem:[%s916_s8] ss:$0 sm:$0xff] }
  0x25   :  { %270 = vmatpush.bf16.msra.mxu1 %v614_v7  ;;  %438 = vmatpush.bf16.msra.mxu3 %v632_v36 }
  0x26   :  { %354 = vmatpush.bf16.msra.mxu2 %v623_v21 }
  0x28   :  { %186 = vmatpush.bf16.msra.mxu0 %v605_v8 }
  0x29   :  { %271 = vmatpush.bf16.msra.mxu1 %v613_v15  ;;  %439 = vmatpush.bf16.msra.mxu3 %v631_v37 }
  0x2a   :  { %355 = vmatpush.bf16.msra.mxu2 %v622_v22 }
  0x2c   :  { %187 = vmatpush.bf16.msra.mxu0 %v604_v9 }
  0x2d   :  { %272 = vmatpush.bf16.msra.mxu1 %v612_v16  ;;  %440 = vmatpush.bf16.msra.mxu3 %v630_v38 }
  0x2e   :  { %356 = vmatpush.bf16.msra.mxu2 %v621_v31 }
  0x30   :  { %188 = vmatpush.bf16.msra.mxu0 %v603_v10 }
  0x31   :  { %273 = vmatpush.bf16.msra.mxu1 %v611_v17  ;;  %441 = vmatpush.bf16.msra.mxu3 %v629_v47 }
  0x32   :  { %357 = vmatpush.bf16.msra.mxu2 %v620_v32 }
  0x34   :  { %189 = vmatpush.bf16.msra.mxu0 %v602_v11 }
  0x35   :  { %274 = vmatpush.bf16.msra.mxu1 %v610_v18  ;;  %442 = vmatpush.bf16.msra.mxu3 %v628_v48 }
  0x36   :  { %358 = vmatpush.bf16.msra.mxu2 %v619_v33 }
  0x37   :  { %190 = vmatmul.bf16.vlgmr.msra.gmra.mxu0 %v113_v14 }
  0x39   :  { %443 = vmatpush.bf16.msra.mxu3 %v627_v49 }
  0x3a   :  { %359 = vmatpush.bf16.msra.mxu2 %v618_v34 }
  0x3d   :  { %444 = vmatpush.bf16.msra.mxu3 %v626_v50 }
  0xb4   :  { %v191_v23 = vpop.f32.mrf.mxu0 }
  0xb5   :  { %v192_v25 = vadd.f32 %v644_v24, %v191_v23 }
  0xb7   :  { %v196_v28 = vmax.f32 %v192_v25, 0.0 }
  0xbc   :  { %v193_v26 = vpop.f32.mrf.mxu0 }
  0xbd   :  { %v194_v27 = vadd.f32 %v644_v24, %v193_v26 }
  0xbf   :  { %v197_v29 = vmax.f32 %v194_v27, 0.0 }
  0xc1   :  { %v198_v30 = vpack.c.bf16 %v197_v29, %v196_v28 }
  0xc3   :  { %275 = vmatmul.bf16.vlgmr.msra.gmra.mxu1 %v198_v30 }
 0x140   :  { %v276_v39 = vpop.f32.mrf.mxu1 }
 0x141   :  { %v277_v41 = vadd.f32 %v645_v40, %v276_v39 }
 0x143   :  { %v281_v44 = vmax.f32 %v277_v41, 0.0 }
 0x148   :  { %v278_v42 = vpop.f32.mrf.mxu1 }
 0x149   :  { %v279_v43 = vadd.f32 %v645_v40, %v278_v42 }
 0x14b   :  { %v282_v45 = vmax.f32 %v279_v43, 0.0 }
 0x14d   :  { %v283_v46 = vpack.c.bf16 %v282_v45, %v281_v44 }
 0x14f   :  { %360 = vmatmul.bf16.vlgmr.msra.gmra.mxu2 %v283_v46 }
 0x1d2   :  { %v361_v51 = vpop.f32.mrf.mxu2 }
 0x1d3   :  { %v362_v53 = vadd.f32 %v646_v52, %v361_v51 }
 0x1d5   :  { %v366_v56 = vmax.f32 %v362_v53, 0.0 }
 0x1da   :  { %v363_v54 = vpop.f32.mrf.mxu2 }
 0x1db   :  { %v364_v55 = vadd.f32 %v646_v52, %v363_v54 }
 0x1dd   :  { %v367_v57 = vmax.f32 %v364_v55, 0.0 }
 0x1df   :  { %v368_v58 = vpack.c.bf16 %v367_v57, %v366_v56 }
 0x1e1   :  { %445 = vmatmul.bf16.vlgmr.msra.gmra.mxu3 %v368_v58 }
 0x264   :  { %v446_v60 = vpop.f32.mrf.mxu3 }
 0x265   :  { %v447_v61 = vadd.f32 %v647_v59, %v446_v60 }
 0x267   :  { %451 = vst [vmem:[#allocation11] sm:$0xff] %v447_v61 }
 0x26c   :  { %v448_v62 = vpop.f32.mrf.mxu3 }
 0x26d   :  { %v449_v63 = vadd.f32 %v647_v59, %v448_v62 }
 0x26f   :  { %452 = vst [vmem:[#allocation11 + $0x8] sm:$0xff] %v449_v63 }
 0x270   :  { %465 = dma.vmem_to_hbm [thread:$0]  %s458_s19, 256, %s460_s6, [#allocation4], %s805_s27, %s805_s27, %s806_s28  }
 0x271   :  { %798 = dma.done.wait [#allocation4], 256  }
 0x272   :  { %799 = vsyncadd [#allocation4], 4294967040 }
 0x273   :  { %470 = vsyncpa [#allocation3], 1 }
 0x274   :  { %471 = vsyncpa [#allocation6], 1 }
 0x275   :  { %472 = vsyncpa [#allocation9], 1 }
 0x276   :  { %473 = vsyncpa [#allocation4], 1 }

</bundles_post_ra>
